<compile_context>
chip_gen: v7x
topology: tpu7x:2x2x1
jax: 0.10.0
libtpu: 0.0.40
codegen_flags: <defaults>
</compile_context>

<pallas_src>
import numpy as np
import jax
import jax.numpy as jnp
from jax.experimental import pallas as pl
from jax.experimental.pallas import tpu as pltpu

K_IN, H1, H2, N_OUT = 1000, 512, 128, 65
N_PAD = 128      # lane-aligned padded logits width (65 -> 128); sliced off in wrapper
TB_ALIGN = 16    # >= (16,128) bf16 min tile rows for the bf16 intermediates


def classifier_kernel(x_ref, w1_ref, b1_ref, w2_ref, b2_ref, w3_ref, b3_ref, o_ref):
    # x arrives f32 (single HBM read, no host-side pad/cast pass); cast to bf16 on
    # the VPU so the MXU runs the cheap bf16 x bf16 -> f32 path.
    x_bf = x_ref[...].astype(jnp.bfloat16)
    # Layer 1: Linear(1000 -> 512) + ReLU   (K=1000 handled internally by Mosaic/MXU)
    h1 = jnp.dot(x_bf, w1_ref[...], preferred_element_type=jnp.float32)
    h1 = jnp.maximum(h1 + b1_ref[...], 0.0)
    # Dropout() -> identity in eval mode.
    # Layer 2: Linear(512 -> 128)
    h2 = jnp.dot(h1.astype(jnp.bfloat16), w2_ref[...],
                 preferred_element_type=jnp.float32)
    h2 = h2 + b2_ref[...]
    # Layer 3: Linear(128 -> 128 padded; weight/bias cols >= 65 are zero)
    h3 = jnp.dot(h2.astype(jnp.bfloat16), w3_ref[...],
                 preferred_element_type=jnp.float32)
    h3 = h3 + b3_ref[...]
    o_ref[...] = h3.astype(o_ref.dtype)


def _round_up(x, m):
    return (x + m - 1) // m * m


def _choose_batch_tile(B, max_tile, prefer_steps):
    """Minimal-padding batch tile that is >=16 rows, <=max_tile, and yields at
    least `prefer_steps` grid steps when B allows it (keeps both v7x TCs busy)."""
    n = max(1, -(-B // max_tile))                     # tiles needed at max_tile
    if n < prefer_steps and B >= prefer_steps * TB_ALIGN:
        n = prefer_steps
    tb = _round_up(-(-B // n), TB_ALIGN)              # ceil(B/n), 16-row aligned
    tb = min(tb, _round_up(max_tile, TB_ALIGN))
    bp = _round_up(B, tb)
    return tb, bp


def prepare_params(params):
    """One-time (init-time) parameter prep. Keeps the hot path free of pad/cast
    kernels: w1/w2/w3 -> bf16 (w3 zero-padded to 128 cols), biases -> f32 rows."""
    w1, b1, w2, b2, w3, b3 = params
    w3_p = jnp.pad(w3, ((0, 0), (0, N_PAD - N_OUT)))
    b3_p = jnp.pad(jnp.reshape(b3, (1, -1)), ((0, 0), (0, N_PAD - N_OUT)))
    return (
        w1.astype(jnp.bfloat16),                          # [1000, 512]
        jnp.reshape(b1, (1, -1)).astype(jnp.float32),     # [1, 512]
        w2.astype(jnp.bfloat16),                          # [512, 128]
        jnp.reshape(b2, (1, -1)).astype(jnp.float32),     # [1, 128]
        w3_p.astype(jnp.bfloat16),                        # [128, 128]
        b3_p.astype(jnp.float32),                         # [1, 128]
    )


def classifier_forward(x, prepared_params, *, max_batch_tile=512, prefer_steps=2,
                       out_dtype=jnp.float32):
    """x: [B, 1000] f32; prepared_params: output of prepare_params().
    Returns [B, 65] logits in `out_dtype` (pass jnp.bfloat16 to halve writeback).
    max_batch_tile: 512 is safe everywhere (v5e 16 MiB scoped VMEM); v6e can use
    1024. prefer_steps=2 keeps both v7x TensorCores busy for medium batches."""
    w1, b1, w2, b2, w3, b3 = prepared_params
    B = x.shape[0]
    x = x.astype(jnp.float32)

    TB, Bp = _choose_batch_tile(B, max_batch_tile, prefer_steps)
    if Bp != B:
        # Only a remainder tile (< TB rows) of zero padding; sliced off below.
        x = jnp.pad(x, ((0, Bp - B), (0, 0)))

    grid = (Bp // TB,)
    flops = 2 * Bp * (K_IN * H1 + H1 * H2 + H2 * N_PAD)
    bytes_accessed = (
        Bp * K_IN * 4                                       # x: single f32 read
        + (w1.size + w2.size + w3.size) * 2                 # bf16 weights (resident)
        + (b1.size + b2.size + b3.size) * 4                 # f32 biases
        + Bp * N_PAD * np.dtype(out_dtype).itemsize         # logits writeback
    )

    out = pl.pallas_call(
        classifier_kernel,
        out_shape=jax.ShapeDtypeStruct((Bp, N_PAD), out_dtype),
        grid_spec=pltpu.PrefetchScalarGridSpec(
            num_scalar_prefetch=0,
            grid=grid,
            in_specs=[
                pl.BlockSpec((TB, K_IN),  lambda i: (i, 0)),   # x streams over batch
                pl.BlockSpec((K_IN, H1),  lambda i: (0, 0)),   # weights stay resident
                pl.BlockSpec((1, H1),     lambda i: (0, 0)),
                pl.BlockSpec((H1, H2),    lambda i: (0, 0)),
                pl.BlockSpec((1, H2),     lambda i: (0, 0)),
                pl.BlockSpec((H2, N_PAD), lambda i: (0, 0)),
                pl.BlockSpec((1, N_PAD),  lambda i: (0, 0)),
            ],
            out_specs=pl.BlockSpec((TB, N_PAD), lambda i: (i, 0)),
        ),
        compiler_params=pltpu.CompilerParams(
            dimension_semantics=("parallel",),
        ),
        cost_estimate=pl.CostEstimate(
            flops=flops, transcendentals=0, bytes_accessed=bytes_accessed),
    )(x, w1, b1, w2, b2, w3, b3)

    # Slice back to the logical output (drop padded rows/cols).
    return out[:B, :N_OUT]


def init_params(key):
    """Deterministic init mimicking PyTorch's default Linear init:
    U(-1/sqrt(fan_in), 1/sqrt(fan_in)) for both weight and bias."""
    dims = [(K_IN, H1), (H1, H2), (H2, N_OUT)]
    params = []
    for (fan_in, fan_out) in dims:
        key, kw, kb = jax.random.split(key, 3)
        bound = 1.0 / np.sqrt(fan_in)
        w = jax.random.uniform(kw, (fan_in, fan_out), jnp.float32, -bound, bound)
        b = jax.random.uniform(kb, (1, fan_out), jnp.float32, -bound, bound)
        params.extend([w, b])
    return tuple(params)


def reference_forward_f32(x, params):
    w1, b1, w2, b2, w3, b3 = params
    h = jnp.maximum(x @ w1 + b1, 0.0)
    h = h @ w2 + b2
    return h @ w3 + b3


def reference_forward_bf16(x, params):
    """Reference mirroring the kernel's bf16-operand / f32-accumulate path."""
    w1, b1, w2, b2, w3, b3 = params
    xb = x.astype(jnp.bfloat16)
    h = jnp.dot(xb, w1.astype(jnp.bfloat16), preferred_element_type=jnp.float32)
    h = jnp.maximum(h + b1, 0.0)
    h = jnp.dot(h.astype(jnp.bfloat16), w2.astype(jnp.bfloat16),
                preferred_element_type=jnp.float32) + b2
    h = jnp.dot(h.astype(jnp.bfloat16), w3.astype(jnp.bfloat16),
                preferred_element_type=jnp.float32) + b3
    return h


if __name__ == "__main__":
    key = jax.random.PRNGKey(0)
    key, kx = jax.random.split(key)
    B = 8
    x = jax.random.normal(kx, (B, K_IN), jnp.float32)
    raw_params = init_params(key)

    # One-time parameter preparation (done at model init, outside the hot path).
    prepared = jax.block_until_ready(prepare_params(raw_params))

    fwd = jax.jit(classifier_forward)
    out = jax.block_until_ready(fwd(x, prepared))
    assert out.shape == (B, N_OUT), out.shape

    # Tight check against a bf16-matched reference (same dtype path as the kernel).
    ref_bf16 = jax.block_until_ready(reference_forward_bf16(x, raw_params))
    np.testing.assert_allclose(np.asarray(out), np.asarray(ref_bf16),
                               rtol=1e-2, atol=1e-2)

    # Loose check against the full-f32 PyTorch-equivalent reference
    # (tolerance intentionally relaxed for bf16 weights/activations).
    ref_f32 = jax.block_until_ready(reference_forward_f32(x, raw_params))
    np.testing.assert_allclose(np.asarray(out), np.asarray(ref_f32),
                               rtol=3e-2, atol=3e-2)

    print("KERNEL_OK")
</pallas_src>

<mosaic_0001>
module attributes {stable_mosaic.version = 11 : i64} {
  func.func @classifier_kernel(%arg0: i32, %arg1: memref<16x1000xf32, #tpu.memory_space<vmem>>, %arg2: memref<1000x512xbf16, #tpu.memory_space<vmem>>, %arg3: memref<1x512xf32, #tpu.memory_space<vmem>>, %arg4: memref<512x128xbf16, #tpu.memory_space<vmem>>, %arg5: memref<1x128xf32, #tpu.memory_space<vmem>>, %arg6: memref<128x128xbf16, #tpu.memory_space<vmem>>, %arg7: memref<1x128xf32, #tpu.memory_space<vmem>>, %arg8: memref<16x128xf32, #tpu.memory_space<vmem>>) attributes {dimension_semantics = [#tpu.dimension_semantics<parallel>], iteration_bounds = array<i64: 1>, scalar_prefetch = 0 : i64, scratch_operands = 0 : i64, tpu.core_type = #tpu.core_type<tc>, window_params = [{transform_indices = @transform_0, window_bounds = array<i64: 16, 1000>}, {pipeline_mode = #tpu.pipeline_mode<synchronous>, transform_indices = @transform_1, window_bounds = array<i64: 1000, 512>}, {pipeline_mode = #tpu.pipeline_mode<synchronous>, transform_indices = @transform_2, window_bounds = array<i64: 1, 512>}, {pipeline_mode = #tpu.pipeline_mode<synchronous>, transform_indices = @transform_3, window_bounds = array<i64: 512, 128>}, {pipeline_mode = #tpu.pipeline_mode<synchronous>, transform_indices = @transform_4, window_bounds = array<i64: 1, 128>}, {pipeline_mode = #tpu.pipeline_mode<synchronous>, transform_indices = @transform_5, window_bounds = array<i64: 128, 128>}, {pipeline_mode = #tpu.pipeline_mode<synchronous>, transform_indices = @transform_6, window_bounds = array<i64: 1, 128>}, {transform_indices = @transform_7, window_bounds = array<i64: 16, 128>}]} {
    %c0 = arith.constant 0 : index
    %c0_0 = arith.constant 0 : index
    %0 = vector.load %arg1[%c0, %c0_0] : memref<16x1000xf32, #tpu.memory_space<vmem>>, vector<16x1000xf32>
    %1 = arith.truncf %0 : vector<16x1000xf32> to vector<16x1000xbf16>
    %c0_1 = arith.constant 0 : index
    %c0_2 = arith.constant 0 : index
    %2 = vector.load %arg2[%c0_1, %c0_2] : memref<1000x512xbf16, #tpu.memory_space<vmem>>, vector<1000x512xbf16>
    %cst = arith.constant dense<0.000000e+00> : vector<16x512xf32>
    %3 = tpu.matmul %1, %2, %cst {dimension_numbers = #tpu.dot_dimension_numbers<[1], [0], [0], [1], [0, 0, 1, 1], [], []>} : vector<16x1000xbf16>, vector<1000x512xbf16>, vector<16x512xf32> -> vector<16x512xf32>
    %c0_3 = arith.constant 0 : index
    %c0_4 = arith.constant 0 : index
    %4 = vector.load %arg3[%c0_3, %c0_4] : memref<1x512xf32, #tpu.memory_space<vmem>>, vector<1x512xf32>
    %5 = vector.broadcast %4 : vector<1x512xf32> to vector<16x512xf32>
    %6 = arith.addf %3, %5 : vector<16x512xf32>
    %cst_5 = arith.constant 0.000000e+00 : f32
    %7 = vector.broadcast %cst_5 : f32 to vector<16x512xf32>
    %8 = arith.maximumf %6, %7 : vector<16x512xf32>
    %9 = arith.truncf %8 : vector<16x512xf32> to vector<16x512xbf16>
    %c0_6 = arith.constant 0 : index
    %c0_7 = arith.constant 0 : index
    %10 = vector.load %arg4[%c0_6, %c0_7] : memref<512x128xbf16, #tpu.memory_space<vmem>>, vector<512x128xbf16>
    %cst_8 = arith.constant dense<0.000000e+00> : vector<16x128xf32>
    %11 = tpu.matmul %9, %10, %cst_8 {dimension_numbers = #tpu.dot_dimension_numbers<[1], [0], [0], [1], [0, 0, 1, 1], [], []>} : vector<16x512xbf16>, vector<512x128xbf16>, vector<16x128xf32> -> vector<16x128xf32>
    %c0_9 = arith.constant 0 : index
    %c0_10 = arith.constant 0 : index
    %12 = vector.load %arg5[%c0_9, %c0_10] : memref<1x128xf32, #tpu.memory_space<vmem>>, vector<1x128xf32>
    %13 = vector.broadcast %12 : vector<1x128xf32> to vector<16x128xf32>
    %14 = arith.addf %11, %13 : vector<16x128xf32>
    %15 = arith.truncf %14 : vector<16x128xf32> to vector<16x128xbf16>
    %c0_11 = arith.constant 0 : index
    %c0_12 = arith.constant 0 : index
    %16 = vector.load %arg6[%c0_11, %c0_12] : memref<128x128xbf16, #tpu.memory_space<vmem>>, vector<128x128xbf16>
    %cst_13 = arith.constant dense<0.000000e+00> : vector<16x128xf32>
    %17 = tpu.matmul %15, %16, %cst_13 {dimension_numbers = #tpu.dot_dimension_numbers<[1], [0], [0], [1], [0, 0, 1, 1], [], []>} : vector<16x128xbf16>, vector<128x128xbf16>, vector<16x128xf32> -> vector<16x128xf32>
    %c0_14 = arith.constant 0 : index
    %c0_15 = arith.constant 0 : index
    %18 = vector.load %arg7[%c0_14, %c0_15] : memref<1x128xf32, #tpu.memory_space<vmem>>, vector<1x128xf32>
    %19 = vector.broadcast %18 : vector<1x128xf32> to vector<16x128xf32>
    %20 = arith.addf %17, %19 : vector<16x128xf32>
    %c0_16 = arith.constant 0 : index
    %c0_17 = arith.constant 0 : index
    %21 = vector.load %arg8[%c0_16, %c0_17] : memref<16x128xf32, #tpu.memory_space<vmem>>, vector<16x128xf32>
    tpu.vector_store %arg8[%c0_16, %c0_17], %20 {strides = array<i32>} : memref<16x128xf32, #tpu.memory_space<vmem>>, vector<16x128xf32>,
    return
  }
  func.func @transform_0(%arg0: i32) -> (i32, i32) {
    %c0_i32 = arith.constant 0 : i32
    %c0_i32_0 = arith.constant 0 : i32
    return %arg0, %c0_i32 : i32, i32
  }
  func.func @transform_1(%arg0: i32) -> (i32, i32) {
    %c0_i32 = arith.constant 0 : i32
    %c0_i32_0 = arith.constant 0 : i32
    %c0_i32_1 = arith.constant 0 : i32
    return %c0_i32, %c0_i32_0 : i32, i32
  }
  func.func @transform_2(%arg0: i32) -> (i32, i32) {
    %c0_i32 = arith.constant 0 : i32
    %c0_i32_0 = arith.constant 0 : i32
    %c0_i32_1 = arith.constant 0 : i32
    return %c0_i32, %c0_i32_0 : i32, i32
  }
  func.func @transform_3(%arg0: i32) -> (i32, i32) {
    %c0_i32 = arith.constant 0 : i32
    %c0_i32_0 = arith.constant 0 : i32
    %c0_i32_1 = arith.constant 0 : i32
    return %c0_i32, %c0_i32_0 : i32, i32
  }
  func.func @transform_4(%arg0: i32) -> (i32, i32) {
    %c0_i32 = arith.constant 0 : i32
    %c0_i32_0 = arith.constant 0 : i32
    %c0_i32_1 = arith.constant 0 : i32
    return %c0_i32, %c0_i32_0 : i32, i32
  }
  func.func @transform_5(%arg0: i32) -> (i32, i32) {
    %c0_i32 = arith.constant 0 : i32
    %c0_i32_0 = arith.constant 0 : i32
    %c0_i32_1 = arith.constant 0 : i32
    return %c0_i32, %c0_i32_0 : i32, i32
  }
  func.func @transform_6(%arg0: i32) -> (i32, i32) {
    %c0_i32 = arith.constant 0 : i32
    %c0_i32_0 = arith.constant 0 : i32
    %c0_i32_1 = arith.constant 0 : i32
    return %c0_i32, %c0_i32_0 : i32, i32
  }
  func.func @transform_7(%arg0: i32) -> (i32, i32) {
    %c0_i32 = arith.constant 0 : i32
    %c0_i32_0 = arith.constant 0 : i32
    return %arg0, %c0_i32 : i32, i32
  }
}

</mosaic_0001>

<bundles_post_ra>
// kernel: classifier_forward.1
= control target key start
LH: loop header
LB: loop body
LE: loop exit
PB: predicated region body
PF: predicated region fallthrough
CT: control target
= control target key end

     0   :  { %12 = vsyncpa [#allocation3], 0  ;;  %s3485_s0 = inlined_call_operand.vmem [shape: f32[16,1000], index: 0, kind: input, shape index: {}]   ;;  %s3486_s1 = inlined_call_operand.hbm [shape: bf16[1000,512], index: 1, kind: input, shape index: {}]   ;;  %s3487_s2 = inlined_call_operand.vmem [shape: f32[1,512], index: 2, kind: input, shape index: {}]   ;;  %s3488_s3 = inlined_call_operand.hbm [shape: bf16[512,128], index: 3, kind: input, shape index: {}]   ;;  %s3489_s4 = inlined_call_operand.vmem [shape: f32[1,128], index: 4, kind: input, shape index: {}]   ;;  %s3490_s5 = inlined_call_operand.vmem [shape: bf16[128,128], index: 5, kind: input, shape index: {}]   ;;  %s3491_s6 = inlined_call_operand.vmem [shape: f32[1,128], index: 6, kind: input, shape index: {}]   ;;  %s3492_s7 = inlined_call_operand.vmem [shape: f32[16,128], index: 7, kind: output, shape index: {}]  }
   0x1   :  { %13 = vsyncpa [#allocation5], 0  ;;  %s3315_s24 = smov [#allocation2]   ;;  %s3267_s28 = scalar_lea.hbm %s3486_s1, 32000 }
   0x2   :  { %s21_s25 = sshll.u32 %s3315_s24, 4  ;;  %p3268_p0 = scmp.ne.s32.totalorder %s3486_s1, %s3267_s28  ;;  %s22_s25 = int_to_ptr.vmem [resolvable:$true] %s21_s25 }
   0x3   :  { %p3271_p1 = scmp.lt.u32.totalorder %s3267_s28, %s3486_s1 }
   0x5   :  { %p3273_p2 = pnand %p3271_p1, %p3268_p0 }
   0x7   :  { %3276 = shalt.err (!%p3273_p2)
}
   0x8   :  { %s3277_s10 = scalar_lea.vmem %s22_s25, 32000  ;;  %p3282_p4 = scmp.lt.s32.totalorder %s22_s25, %s22_s25 }
   0x9   :  { %p3278_p3 = scmp.ne.s32.totalorder %s22_s25, %s3277_s10  ;;  %p3283_p5 = scmp.lt.s32.totalorder %s3277_s10, %s3277_s10 }
   0xb   :  { %p3284_p6 = por %p3283_p5, %p3282_p4 }
   0xd   :  { %p3285_p7 = pnand %p3284_p6, %p3278_p3 }
   0xf   :  { %3288 = shalt.err (!%p3285_p7)
}
  0x10   :  { %s3316_s11 = smov 256   ;;  %s3317_s12 = smov 16  }
  0x11   :  { %27 = dma.hbm_to_vmem [thread:$0]  %s3486_s1, 32000, %s22_s25, [#allocation3], %s3316_s11, %s3316_s11, %s3317_s12  }
  0x12   :  { %s3318_s15 = smov [#allocation4]   ;;  %s3289_s19 = scalar_lea.hbm %s3488_s3, 4096 }
  0x13   :  { %s35_s16 = sshll.u32 %s3318_s15, 4  ;;  %p3290_p8 = scmp.ne.s32.totalorder %s3488_s3, %s3289_s19  ;;  %s36_s16 = int_to_ptr.vmem [resolvable:$true] %s35_s16 }
  0x14   :  { %p3293_p9 = scmp.lt.u32.totalorder %s3289_s19, %s3488_s3 }
  0x16   :  { %p3295_p10 = pnand %p3293_p9, %p3290_p8 }
  0x18   :  { %3298 = shalt.err (!%p3295_p10)
}
  0x19   :  { %s3299_s24 = scalar_lea.vmem %s36_s16, 4096  ;;  %p3304_p12 = scmp.lt.s32.totalorder %s36_s16, %s36_s16 }
  0x1a   :  { %p3300_p11 = scmp.ne.s32.totalorder %s36_s16, %s3299_s24  ;;  %p3305_p13 = scmp.lt.s32.totalorder %s3299_s24, %s3299_s24 }
  0x1c   :  { %p3306_p0 = por %p3305_p13, %p3304_p12 }
  0x1e   :  { %p3307_p1 = pnand %p3306_p0, %p3300_p11 }
  0x20   :  { %3310 = shalt.err (!%p3307_p1)
}
  0x21   :  { %s3319_s1 = smov 64   ;;  %s3320_s25 = smov 4  }
  0x22   :  { %41 = dma.hbm_to_vmem [thread:$0]  %s3488_s3, 4096, %s36_s16, [#allocation5], %s3319_s1, %s3319_s1, %s3320_s25  }
  0x23   :  { %3311 = dma.done.wait [#allocation3], 32000  }
  0x24   :  { %3312 = vsyncadd [#allocation3], 4294935296 }
  0x25   :  { %3313 = dma.done.wait [#allocation5], 4096  }
  0x26   :  { %3314 = vsyncadd [#allocation5], 4294963200  ;;  %v2851_v0 = vld [vmem:[#allocation2 + $0x4] ss:$16 sps:$4 sm:$0xff]   ;;  %v2853_v1 = vld [vmem:[#allocation2 + $0xc] ss:$16 sps:$4 sm:$0xff]  }
  0x27   :  { %1618 = vmatprep.subr.bf16.mxu0 %v2851_v0  ;;  %v2855_v2 = vld [vmem:[#allocation2] ss:$16 sps:$4 sm:$0xff]   ;;  %v2856_v3 = vld [vmem:[#allocation2 + $0x8] ss:$16 sps:$4 sm:$0xff]   ;;  %1790 = vmatprep.subr.bf16.mxu1 %v2853_v1  ;;  %v2857_v4 = vld [vmem:[#allocation2 + $0x24] ss:$16 sps:$4 sm:$0xff]  }
  0x28   :  { %1619 = vmatpush1.bf16.msra.mxu0 %v2855_v2  ;;  %1791 = vmatpush1.bf16.msra.mxu1 %v2856_v3  ;;  %v2859_v5 = vld [vmem:[#allocation2 + $0x2c] ss:$16 sps:$4 sm:$0xff]   ;;  %v2861_v6 = vld [vmem:[#allocation2 + $0x20] ss:$16 sps:$4 sm:$0xff]   ;;  %v2862_v7 = vld [vmem:[#allocation2 + $0x28] ss:$16 sps:$4 sm:$0xff]  }
  0x29   :  { %1620 = vmatprep.subr.bf16.mxu0 %v2857_v4  ;;  %1792 = vmatprep.subr.bf16.mxu1 %v2859_v5  ;;  %v2863_v8 = vld [vmem:[#allocation2 + $0x44] ss:$16 sps:$4 sm:$0xff]   ;;  %v2865_v9 = vld [vmem:[#allocation2 + $0x4c] ss:$16 sps:$4 sm:$0xff]   ;;  %v2867_v10 = vld [vmem:[#allocation2 + $0x40] ss:$16 sps:$4 sm:$0xff]  }
  0x2a   :  { %v2868_v11 = vld [vmem:[#allocation2 + $0x48] ss:$16 sps:$4 sm:$0xff]   ;;  %v2869_v12 = vld [vmem:[#allocation2 + $0x64] ss:$16 sps:$4 sm:$0xff]   ;;  %v2871_v13 = vld [vmem:[#allocation2 + $0x6c] ss:$16 sps:$4 sm:$0xff]  }
  0x2b   :  { %v2873_v14 = vld [vmem:[#allocation2 + $0x60] ss:$16 sps:$4 sm:$0xff]   ;;  %v2874_v15 = vld [vmem:[#allocation2 + $0x68] ss:$16 sps:$4 sm:$0xff]   ;;  %v2875_v16 = vld [vmem:[#allocation2 + $0x84] ss:$16 sps:$4 sm:$0xff]  }
  0x2c   :  { %1621 = vmatpush1.bf16.msra.mxu0 %v2861_v6  ;;  %1793 = vmatpush1.bf16.msra.mxu1 %v2862_v7  ;;  %v2877_v17 = vld [vmem:[#allocation2 + $0x8c] ss:$16 sps:$4 sm:$0xff]   ;;  %v2879_v18 = vld [vmem:[#allocation2 + $0x80] ss:$16 sps:$4 sm:$0xff]   ;;  %v2880_v19 = vld [vmem:[#allocation2 + $0x88] ss:$16 sps:$4 sm:$0xff]  }
  0x2d   :  { %1622 = vmatprep.subr.bf16.mxu0 %v2863_v8  ;;  %1794 = vmatprep.subr.bf16.mxu1 %v2865_v9  ;;  %v2881_v20 = vld [vmem:[#allocation2 + $0xa4] ss:$16 sps:$4 sm:$0xff]   ;;  %v2883_v21 = vld [vmem:[#allocation2 + $0xac] ss:$16 sps:$4 sm:$0xff]   ;;  %v2885_v22 = vld [vmem:[#allocation2 + $0xa0] ss:$16 sps:$4 sm:$0xff]  }
  0x2e   :  { %v2886_v23 = vld [vmem:[#allocation2 + $0xa8] ss:$16 sps:$4 sm:$0xff]   ;;  %v2887_v24 = vld [vmem:[#allocation2 + $0xc4] ss:$16 sps:$4 sm:$0xff]   ;;  %v2889_v25 = vld [vmem:[#allocation2 + $0xcc] ss:$16 sps:$4 sm:$0xff]  }
  0x2f   :  { %v2891_v26 = vld [vmem:[#allocation2 + $0xc0] ss:$16 sps:$4 sm:$0xff]   ;;  %v2892_v27 = vld [vmem:[#allocation2 + $0xc8] ss:$16 sps:$4 sm:$0xff]   ;;  %v2893_v28 = vld [vmem:[#allocation2 + $0xe4] ss:$16 sps:$4 sm:$0xff]  }
  0x30   :  { %1623 = vmatpush1.bf16.msra.mxu0 %v2867_v10  ;;  %1795 = vmatpush1.bf16.msra.mxu1 %v2868_v11  ;;  %v2895_v29 = vld [vmem:[#allocation2 + $0xec] ss:$16 sps:$4 sm:$0xff]   ;;  %v2897_v30 = vld [vmem:[#allocation2 + $0xe0] ss:$16 sps:$4 sm:$0xff]   ;;  %v2898_v31 = vld [vmem:[#allocation2 + $0xe8] ss:$16 sps:$4 sm:$0xff]  }
  0x31   :  { %1624 = vmatprep.subr.bf16.mxu0 %v2869_v12  ;;  %1796 = vmatprep.subr.bf16.mxu1 %v2871_v13  ;;  %v2899_v32 = vld [vmem:[#allocation2 + $0x104] ss:$16 sps:$4 sm:$0xff]   ;;  %v2901_v33 = vld [vmem:[#allocation2 + $0x10c] ss:$16 sps:$4 sm:$0xff]   ;;  %v2903_v34 = vld [vmem:[#allocation2 + $0x100] ss:$16 sps:$4 sm:$0xff]  }
  0x32   :  { %v2904_v35 = vld [vmem:[#allocation2 + $0x108] ss:$16 sps:$4 sm:$0xff]   ;;  %v2905_v36 = vld [vmem:[#allocation2 + $0x124] ss:$16 sps:$4 sm:$0xff]   ;;  %v2907_v37 = vld [vmem:[#allocation2 + $0x12c] ss:$16 sps:$4 sm:$0xff]  }
  0x33   :  { %v2909_v38 = vld [vmem:[#allocation2 + $0x120] ss:$16 sps:$4 sm:$0xff]   ;;  %v2910_v39 = vld [vmem:[#allocation2 + $0x128] ss:$16 sps:$4 sm:$0xff]   ;;  %v2911_v40 = vld [vmem:[#allocation2 + $0x144] ss:$16 sps:$4 sm:$0xff]  }
  0x34   :  { %1625 = vmatpush1.bf16.msra.mxu0 %v2873_v14  ;;  %1797 = vmatpush1.bf16.msra.mxu1 %v2874_v15  ;;  %v2913_v41 = vld [vmem:[#allocation2 + $0x14c] ss:$16 sps:$4 sm:$0xff]   ;;  %v2915_v42 = vld [vmem:[#allocation2 + $0x140] ss:$16 sps:$4 sm:$0xff]   ;;  %v2916_v43 = vld [vmem:[#allocation2 + $0x148] ss:$16 sps:$4 sm:$0xff]  }
  0x35   :  { %1626 = vmatprep.subr.bf16.mxu0 %v2875_v16  ;;  %1798 = vmatprep.subr.bf16.mxu1 %v2877_v17  ;;  %v2917_v44 = vld [vmem:[#allocation2 + $0x164] ss:$16 sps:$4 sm:$0xff]   ;;  %v2919_v45 = vld [vmem:[#allocation2 + $0x16c] ss:$16 sps:$4 sm:$0xff]   ;;  %v2921_v48 = vld [vmem:[#allocation2 + $0x160] ss:$16 sps:$4 sm:$0xff]  }
  0x36   :  { %v56_v46 = vld [vmem:[%s3485_s0 + $0x8] sm:$0xff]  ;;  %v2923_v51 = vld [vmem:[#allocation2 + $0x184] ss:$16 sps:$4 sm:$0xff]   ;;  %v2927_v53 = vld [vmem:[#allocation2 + $0x180] ss:$16 sps:$4 sm:$0xff]   ;;  %vm1601_vm0 = vcmask 850944  }
  0x37   :  { %v64_v47 = vld [vmem:[%s3485_s0 + $0x48] sm:$0xff]  ;;  %v2929_v55 = vld [vmem:[#allocation2 + $0x1a4] ss:$16 sps:$4 sm:$0xff]   ;;  %v2933_v57 = vld [vmem:[#allocation2 + $0x1a0] ss:$16 sps:$4 sm:$0xff]   ;;  %vm1605_vm1 = vcmask 1043456  }
  0x38   :  { %1627 = vmatpush1.bf16.msra.mxu0 %v2879_v18  ;;  %1799 = vmatpush1.bf16.msra.mxu1 %v2880_v19  ;;  %v2922_v49 = vld [vmem:[#allocation2 + $0x168] ss:$16 sps:$4 sm:$0xff]   ;;  %v72_v50 = vpack.c.bf16 %v64_v47, %v56_v46  ;;  %v2925_v52 = vld [vmem:[#allocation2 + $0x18c] ss:$16 sps:$4 sm:$0xff]   ;;  %v2935_v59 = vld [vmem:[#allocation2 + $0x1c4] ss:$16 sps:$4 sm:$0xff]  }
  0x39   :  { %1628 = vmatprep.subr.bf16.mxu0 %v2881_v20  ;;  %1800 = vmatprep.subr.bf16.mxu1 %v2883_v21  ;;  %v2928_v54 = vld [vmem:[#allocation2 + $0x188] ss:$16 sps:$4 sm:$0xff]   ;;  %v2931_v56 = vld [vmem:[#allocation2 + $0x1ac] ss:$16 sps:$4 sm:$0xff]   ;;  %v2939_v61 = vld [vmem:[#allocation2 + $0x1c0] ss:$16 sps:$4 sm:$0xff]  }
  0x3a   :  { %1650 = vmatprep.mubr.bf16.mxu0 %v72_v50  ;;  %1822 = vmatprep.mubr.bf16.mxu1 %v72_v50  ;;  %v2934_v58 = vld [vmem:[#allocation2 + $0x1a8] ss:$16 sps:$4 sm:$0xff]   ;;  %v2937_v60 = vld [vmem:[#allocation2 + $0x1cc] ss:$16 sps:$4 sm:$0xff]   ;;  %v2941_v63 = vld [vmem:[#allocation2 + $0x1e4] ss:$16 sps:$4 sm:$0xff]  }
  0x3b   :  { %v2940_v62 = vld [vmem:[#allocation2 + $0x1c8] ss:$16 sps:$4 sm:$0xff]   ;;  %v2943_v0 = vld [vmem:[#allocation2 + $0x1ec] ss:$16 sps:$4 sm:$0xff]   ;;  %v2945_v1 = vld [vmem:[#allocation2 + $0x1e0] ss:$16 sps:$4 sm:$0xff]  }
  0x3c   :  { %1629 = vmatpush1.bf16.msra.mxu0 %v2885_v22  ;;  %1801 = vmatpush1.bf16.msra.mxu1 %v2886_v23  ;;  %v2946_v2 = vld [vmem:[#allocation2 + $0x1e8] ss:$16 sps:$4 sm:$0xff]   ;;  %v2949_v3 = vld [vmem:[#allocation2 + $0x204] ss:$16 sps:$4 sm:$0xff]   ;;  %v2952_v6 = vld [vmem:[#allocation2 + $0x20c] ss:$16 sps:$4 sm:$0xff]  }
  0x3d   :  { %1630 = vmatprep.subr.bf16.mxu0 %v2887_v24  ;;  %1802 = vmatprep.subr.bf16.mxu1 %v2889_v25  ;;  %v55_v4 = vld [vmem:[%s3485_s0] sm:$0xff]  ;;  %v2950_v8 = vld [vmem:[#allocation2 + $0x208] ss:$16 sps:$4 sm:$0xff]   ;;  %v2958_v11 = vld [vmem:[#allocation2 + $0x22c] ss:$16 sps:$4 sm:$0xff]   ;;  %vm3322_vm2 = vmmov 0  }
  0x3e   :  { %v63_v5 = vld [vmem:[%s3485_s0 + $0x40] sm:$0xff]  ;;  %v2956_v13 = vld [vmem:[#allocation2 + $0x228] ss:$16 sps:$4 sm:$0xff]   ;;  %v2964_v15 = vld [vmem:[#allocation2 + $0x24c] ss:$16 sps:$4 sm:$0xff]  }
  0x3f   :  { %v2947_v7 = vld [vmem:[#allocation2 + $0x200] ss:$16 sps:$4 sm:$0xff]   ;;  %v71_v9 = vpack.c.bf16 %v63_v5, %v55_v4  ;;  %v2955_v10 = vld [vmem:[#allocation2 + $0x224] ss:$16 sps:$4 sm:$0xff]   ;;  %v2962_v17 = vld [vmem:[#allocation2 + $0x248] ss:$16 sps:$4 sm:$0xff]  }
  0x40   :  { %1631 = vmatpush1.bf16.msra.mxu0 %v2891_v26  ;;  %1803 = vmatpush1.bf16.msra.mxu1 %v2892_v27  ;;  %v2953_v12 = vld [vmem:[#allocation2 + $0x220] ss:$16 sps:$4 sm:$0xff]   ;;  %v2961_v14 = vld [vmem:[#allocation2 + $0x244] ss:$16 sps:$4 sm:$0xff]   ;;  %v2970_v19 = vld [vmem:[#allocation2 + $0x26c] ss:$16 sps:$4 sm:$0xff]  }
  0x41   :  { %1632 = vmatprep.subr.bf16.mxu0 %v2893_v28  ;;  %1804 = vmatprep.subr.bf16.mxu1 %v2895_v29  ;;  %v2959_v16 = vld [vmem:[#allocation2 + $0x240] ss:$16 sps:$4 sm:$0xff]   ;;  %v2967_v18 = vld [vmem:[#allocation2 + $0x264] ss:$16 sps:$4 sm:$0xff]   ;;  %v2968_v21 = vld [vmem:[#allocation2 + $0x268] ss:$16 sps:$4 sm:$0xff]  }
  0x42   :  { %v2965_v20 = vld [vmem:[#allocation2 + $0x260] ss:$16 sps:$4 sm:$0xff]   ;;  %v2973_v22 = vld [vmem:[#allocation2 + $0x284] ss:$16 sps:$4 sm:$0xff]   ;;  %v2976_v23 = vld [vmem:[#allocation2 + $0x28c] ss:$16 sps:$4 sm:$0xff]  }
  0x43   :  { %v2971_v24 = vld [vmem:[#allocation2 + $0x280] ss:$16 sps:$4 sm:$0xff]   ;;  %v2974_v25 = vld [vmem:[#allocation2 + $0x288] ss:$16 sps:$4 sm:$0xff]   ;;  %v2979_v26 = vld [vmem:[#allocation2 + $0x2a4] ss:$16 sps:$4 sm:$0xff]  }
  0x44   :  { %1633 = vmatpush1.bf16.msra.mxu0 %v2897_v30  ;;  %1805 = vmatpush1.bf16.msra.mxu1 %v2898_v31  ;;  %v2982_v27 = vld [vmem:[#allocation2 + $0x2ac] ss:$16 sps:$4 sm:$0xff]   ;;  %v2977_v28 = vld [vmem:[#allocation2 + $0x2a0] ss:$16 sps:$4 sm:$0xff]   ;;  %v2980_v29 = vld [vmem:[#allocation2 + $0x2a8] ss:$16 sps:$4 sm:$0xff]  }
  0x45   :  { %1634 = vmatprep.subr.bf16.mxu0 %v2899_v32  ;;  %1806 = vmatprep.subr.bf16.mxu1 %v2901_v33  ;;  %v2985_v30 = vld [vmem:[#allocation2 + $0x2c4] ss:$16 sps:$4 sm:$0xff]   ;;  %v2988_v31 = vld [vmem:[#allocation2 + $0x2cc] ss:$16 sps:$4 sm:$0xff]   ;;  %v3001_v47 = vld [vmem:[#allocation2 + $0x320] ss:$16 sps:$4 sm:$0xff]  }
  0x46   :  { %v58_v32 = vld [vmem:[%s3485_s0 + $0x18] sm:$0xff]  ;;  %v3039_v5 = vld [vmem:[#allocation2 + $0x3e4] ss:$16 sps:$4 sm:$0xff]  }
  0x47   :  { %v66_v33 = vld [vmem:[%s3485_s0 + $0x58] sm:$0xff] }
  0x48   :  { %1635 = vmatpush1.bf16.msra.mxu0 %v2903_v34  ;;  %1807 = vmatpush1.bf16.msra.mxu1 %v2904_v35  ;;  %v2983_v34 = vld [vmem:[#allocation2 + $0x2c0] ss:$16 sps:$4 sm:$0xff]   ;;  %v2986_v35 = vld [vmem:[#allocation2 + $0x2c8] ss:$16 sps:$4 sm:$0xff]   ;;  %v3006_v46 = vld [vmem:[#allocation2 + $0x32c] ss:$16 sps:$4 sm:$0xff]  }
  0x49   :  { %1636 = vmatprep.subr.bf16.mxu0 %v2905_v36  ;;  %1808 = vmatprep.subr.bf16.mxu1 %v2907_v37  ;;  %v74_v36 = vpack.c.bf16 %v66_v33, %v58_v32  ;;  %v2991_v37 = vld [vmem:[#allocation2 + $0x2e4] ss:$16 sps:$4 sm:$0xff]   ;;  %v3012_v50 = vld [vmem:[#allocation2 + $0x34c] ss:$16 sps:$4 sm:$0xff]   ;;  %v3034_v4 = vld [vmem:[#allocation2 + $0x3c8] ss:$16 sps:$4 sm:$0xff]  }
  0x4a   :  { %v3072_v32 = vld [vmem:[#allocation2 + $0x48c] ss:$16 sps:$4 sm:$0xff]   ;;  %v3067_v33 = vld [vmem:[#allocation2 + $0x480] ss:$16 sps:$4 sm:$0xff]  }
  0x4c   :  { %1637 = vmatpush1.bf16.msra.mxu0 %v2909_v38  ;;  %1809 = vmatpush1.bf16.msra.mxu1 %v2910_v39  ;;  %v2994_v38 = vld [vmem:[#allocation2 + $0x2ec] ss:$16 sps:$4 sm:$0xff]   ;;  %v2989_v39 = vld [vmem:[#allocation2 + $0x2e0] ss:$16 sps:$4 sm:$0xff]  }
  0x4d   :  { %1638 = vmatprep.subr.bf16.mxu0 %v2911_v40  ;;  %1810 = vmatprep.subr.bf16.mxu1 %v2913_v41  ;;  %v2992_v40 = vld [vmem:[#allocation2 + $0x2e8] ss:$16 sps:$4 sm:$0xff]   ;;  %v2997_v41 = vld [vmem:[#allocation2 + $0x304] ss:$16 sps:$4 sm:$0xff]  }
  0x50   :  { %1639 = vmatpush1.bf16.msra.mxu0 %v2915_v42  ;;  %1811 = vmatpush1.bf16.msra.mxu1 %v2916_v43  ;;  %v3000_v42 = vld [vmem:[#allocation2 + $0x30c] ss:$16 sps:$4 sm:$0xff]   ;;  %v2995_v43 = vld [vmem:[#allocation2 + $0x300] ss:$16 sps:$4 sm:$0xff]  }
  0x51   :  { %1640 = vmatprep.subr.bf16.mxu0 %v2917_v44  ;;  %1812 = vmatprep.subr.bf16.mxu1 %v2919_v45  ;;  %v2998_v44 = vld [vmem:[#allocation2 + $0x308] ss:$16 sps:$4 sm:$0xff]   ;;  %v3003_v45 = vld [vmem:[#allocation2 + $0x324] ss:$16 sps:$4 sm:$0xff]  }
  0x54   :  { %1641 = vmatpush1.bf16.msra.mxu0 %v2921_v48  ;;  %1813 = vmatpush1.bf16.msra.mxu1 %v2922_v49  ;;  %v3004_v48 = vld [vmem:[#allocation2 + $0x328] ss:$16 sps:$4 sm:$0xff]   ;;  %v3009_v49 = vld [vmem:[#allocation2 + $0x344] ss:$16 sps:$4 sm:$0xff]  }
  0x55   :  { %1642 = vmatprep.subr.bf16.mxu0 %v2923_v51  ;;  %1814 = vmatprep.subr.bf16.mxu1 %v2925_v52  ;;  %v3007_v51 = vld [vmem:[#allocation2 + $0x340] ss:$16 sps:$4 sm:$0xff]   ;;  %v3010_v52 = vld [vmem:[#allocation2 + $0x348] ss:$16 sps:$4 sm:$0xff]  }
  0x58   :  { %1643 = vmatpush1.bf16.msra.mxu0 %v2927_v53  ;;  %1815 = vmatpush1.bf16.msra.mxu1 %v2928_v54  ;;  %v3015_v53 = vld [vmem:[#allocation2 + $0x364] ss:$16 sps:$4 sm:$0xff]   ;;  %v3018_v54 = vld [vmem:[#allocation2 + $0x36c] ss:$16 sps:$4 sm:$0xff]  }
  0x59   :  { %1644 = vmatprep.subr.bf16.mxu0 %v2929_v55  ;;  %1816 = vmatprep.subr.bf16.mxu1 %v2931_v56  ;;  %v3013_v55 = vld [vmem:[#allocation2 + $0x360] ss:$16 sps:$4 sm:$0xff]   ;;  %v3016_v56 = vld [vmem:[#allocation2 + $0x368] ss:$16 sps:$4 sm:$0xff]  }
  0x5c   :  { %1645 = vmatpush1.bf16.msra.mxu0 %v2933_v57  ;;  %1817 = vmatpush1.bf16.msra.mxu1 %v2934_v58  ;;  %v3021_v57 = vld [vmem:[#allocation2 + $0x384] ss:$16 sps:$4 sm:$0xff]   ;;  %v3024_v58 = vld [vmem:[#allocation2 + $0x38c] ss:$16 sps:$4 sm:$0xff]  }
  0x5d   :  { %1646 = vmatprep.subr.bf16.mxu0 %v2935_v59  ;;  %1818 = vmatprep.subr.bf16.mxu1 %v2937_v60  ;;  %v3019_v59 = vld [vmem:[#allocation2 + $0x380] ss:$16 sps:$4 sm:$0xff]   ;;  %v3022_v60 = vld [vmem:[#allocation2 + $0x388] ss:$16 sps:$4 sm:$0xff]  }
  0x60   :  { %1647 = vmatpush1.bf16.msra.mxu0 %v2939_v61  ;;  %1819 = vmatpush1.bf16.msra.mxu1 %v2940_v62  ;;  %v3027_v61 = vld [vmem:[#allocation2 + $0x3a4] ss:$16 sps:$4 sm:$0xff]   ;;  %v3030_v62 = vld [vmem:[#allocation2 + $0x3ac] ss:$16 sps:$4 sm:$0xff]  }
  0x61   :  { %1648 = vmatprep.subr.bf16.mxu0 %v2941_v63  ;;  %1820 = vmatprep.subr.bf16.mxu1 %v2943_v0  ;;  %v3025_v63 = vld [vmem:[#allocation2 + $0x3a0] ss:$16 sps:$4 sm:$0xff]   ;;  %v3028_v0 = vld [vmem:[#allocation2 + $0x3a8] ss:$16 sps:$4 sm:$0xff]  }
  0x64   :  { %1649 = vmatpush1.bf16.msra.mxu0 %v2945_v1  ;;  %1821 = vmatpush1.bf16.msra.mxu1 %v2946_v2  ;;  %v3033_v1 = vld [vmem:[#allocation2 + $0x3c4] ss:$16 sps:$4 sm:$0xff]   ;;  %v3036_v2 = vld [vmem:[#allocation2 + $0x3cc] ss:$16 sps:$4 sm:$0xff]  }
  0x65   :  { %1661 = vmatprep.subr.bf16.mxu0 %v2949_v3  ;;  %1833 = vmatprep.subr.bf16.mxu1 %v2952_v6  ;;  %v3031_v3 = vld [vmem:[#allocation2 + $0x3c0] ss:$16 sps:$4 sm:$0xff]   ;;  %v3042_v6 = vld [vmem:[#allocation2 + $0x3ec] ss:$16 sps:$4 sm:$0xff]  }
  0x67   :  { %1651 = vmatmul.mubr.bf16.vlgmr.msra.gmra.mrb[0].mxu0 %v71_v9  ;;  %1823 = vmatmul.mubr.bf16.vlgmr.msra.gmra.mrb[0].mxu1 %v71_v9  ;;  %v3045_v9 = vld [vmem:[#allocation2 + $0x404] ss:$16 sps:$4 sm:$0xff]  }
  0x68   :  { %1662 = vmatpush1.bf16.msra.mxu0 %v2947_v7  ;;  %1834 = vmatpush1.bf16.msra.mxu1 %v2950_v8  ;;  %v3037_v7 = vld [vmem:[#allocation2 + $0x3e0] ss:$16 sps:$4 sm:$0xff]   ;;  %v3040_v8 = vld [vmem:[#allocation2 + $0x3e8] ss:$16 sps:$4 sm:$0xff]  }
  0x69   :  { %1663 = vmatprep.subr.bf16.mxu0 %v2955_v10  ;;  %1835 = vmatprep.subr.bf16.mxu1 %v2958_v11  ;;  %v57_v10 = vld [vmem:[%s3485_s0 + $0x10] sm:$0xff] }
  0x6a   :  { %1693 = vmatprep.mubr.bf16.mxu0 %v74_v36  ;;  %1865 = vmatprep.mubr.bf16.mxu1 %v74_v36  ;;  %v65_v11 = vld [vmem:[%s3485_s0 + $0x50] sm:$0xff]  ;;  %v3078_v36 = vld [vmem:[#allocation2 + $0x4ac] ss:$16 sps:$4 sm:$0xff]  }
  0x6c   :  { %1664 = vmatpush1.bf16.msra.mxu0 %v2953_v12  ;;  %1836 = vmatpush1.bf16.msra.mxu1 %v2956_v13  ;;  %v3048_v12 = vld [vmem:[#allocation2 + $0x40c] ss:$16 sps:$4 sm:$0xff]   ;;  %v3043_v13 = vld [vmem:[#allocation2 + $0x400] ss:$16 sps:$4 sm:$0xff]  }
  0x6d   :  { %1665 = vmatprep.subr.bf16.mxu0 %v2961_v14  ;;  %1837 = vmatprep.subr.bf16.mxu1 %v2964_v15  ;;  %v3046_v14 = vld [vmem:[#allocation2 + $0x408] ss:$16 sps:$4 sm:$0xff]   ;;  %v73_v15 = vpack.c.bf16 %v65_v11, %v57_v10  ;;  %v3135_v11 = vld [vmem:[#allocation2 + $0x5e4] ss:$16 sps:$4 sm:$0xff]  }
  0x6e   :  { %v3130_v10 = vld [vmem:[#allocation2 + $0x5c8] ss:$16 sps:$4 sm:$0xff]  }
  0x70   :  { %1666 = vmatpush1.bf16.msra.mxu0 %v2959_v16  ;;  %1838 = vmatpush1.bf16.msra.mxu1 %v2962_v17  ;;  %v3051_v16 = vld [vmem:[#allocation2 + $0x424] ss:$16 sps:$4 sm:$0xff]   ;;  %v3054_v17 = vld [vmem:[#allocation2 + $0x42c] ss:$16 sps:$4 sm:$0xff]  }
  0x71   :  { %1667 = vmatprep.subr.bf16.mxu0 %v2967_v18  ;;  %1839 = vmatprep.subr.bf16.mxu1 %v2970_v19  ;;  %v60_v18 = vld [vmem:[%s3485_s0 + $0x28] sm:$0xff] }
  0x72   :  { %v68_v19 = vld [vmem:[%s3485_s0 + $0x68] sm:$0xff] }
  0x74   :  { %1668 = vmatpush1.bf16.msra.mxu0 %v2965_v20  ;;  %1840 = vmatpush1.bf16.msra.mxu1 %v2968_v21  ;;  %v3049_v20 = vld [vmem:[#allocation2 + $0x420] ss:$16 sps:$4 sm:$0xff]   ;;  %v3052_v21 = vld [vmem:[#allocation2 + $0x428] ss:$16 sps:$4 sm:$0xff]  }
  0x75   :  { %1669 = vmatprep.subr.bf16.mxu0 %v2973_v22  ;;  %1841 = vmatprep.subr.bf16.mxu1 %v2976_v23  ;;  %v76_v22 = vpack.c.bf16 %v68_v19, %v60_v18  ;;  %v3057_v23 = vld [vmem:[#allocation2 + $0x444] ss:$16 sps:$4 sm:$0xff]   ;;  %v3144_v18 = vld [vmem:[#allocation2 + $0x60c] ss:$16 sps:$4 sm:$0xff]   ;;  %v3139_v19 = vld [vmem:[#allocation2 + $0x600] ss:$16 sps:$4 sm:$0xff]  }
  0x78   :  { %1670 = vmatpush1.bf16.msra.mxu0 %v2971_v24  ;;  %1842 = vmatpush1.bf16.msra.mxu1 %v2974_v25  ;;  %v3060_v24 = vld [vmem:[#allocation2 + $0x44c] ss:$16 sps:$4 sm:$0xff]   ;;  %v3055_v25 = vld [vmem:[#allocation2 + $0x440] ss:$16 sps:$4 sm:$0xff]  }
  0x79   :  { %1671 = vmatprep.subr.bf16.mxu0 %v2979_v26  ;;  %1843 = vmatprep.subr.bf16.mxu1 %v2982_v27  ;;  %v3058_v26 = vld [vmem:[#allocation2 + $0x448] ss:$16 sps:$4 sm:$0xff]   ;;  %v3063_v27 = vld [vmem:[#allocation2 + $0x464] ss:$16 sps:$4 sm:$0xff]  }
  0x7c   :  { %1672 = vmatpush1.bf16.msra.mxu0 %v2977_v28  ;;  %1844 = vmatpush1.bf16.msra.mxu1 %v2980_v29  ;;  %v3066_v28 = vld [vmem:[#allocation2 + $0x46c] ss:$16 sps:$4 sm:$0xff]   ;;  %v3061_v29 = vld [vmem:[#allocation2 + $0x460] ss:$16 sps:$4 sm:$0xff]  }
  0x7d   :  { %1673 = vmatprep.subr.bf16.mxu0 %v2985_v30  ;;  %1845 = vmatprep.subr.bf16.mxu1 %v2988_v31  ;;  %v3064_v30 = vld [vmem:[#allocation2 + $0x468] ss:$16 sps:$4 sm:$0xff]   ;;  %v3069_v31 = vld [vmem:[#allocation2 + $0x484] ss:$16 sps:$4 sm:$0xff]  }
  0x80   :  { %1674 = vmatpush1.bf16.msra.mxu0 %v2983_v34  ;;  %1846 = vmatpush1.bf16.msra.mxu1 %v2986_v35  ;;  %v3070_v34 = vld [vmem:[#allocation2 + $0x488] ss:$16 sps:$4 sm:$0xff]   ;;  %v3075_v35 = vld [vmem:[#allocation2 + $0x4a4] ss:$16 sps:$4 sm:$0xff]  }
  0x81   :  { %1675 = vmatprep.subr.bf16.mxu0 %v2991_v37  ;;  %1847 = vmatprep.subr.bf16.mxu1 %v2994_v38  ;;  %v3073_v37 = vld [vmem:[#allocation2 + $0x4a0] ss:$16 sps:$4 sm:$0xff]   ;;  %v3076_v38 = vld [vmem:[#allocation2 + $0x4a8] ss:$16 sps:$4 sm:$0xff]  }
  0x84   :  { %1676 = vmatpush1.bf16.msra.mxu0 %v2989_v39  ;;  %1848 = vmatpush1.bf16.msra.mxu1 %v2992_v40  ;;  %v3081_v39 = vld [vmem:[#allocation2 + $0x4c4] ss:$16 sps:$4 sm:$0xff]   ;;  %v3084_v40 = vld [vmem:[#allocation2 + $0x4cc] ss:$16 sps:$4 sm:$0xff]  }
  0x85   :  { %1677 = vmatprep.subr.bf16.mxu0 %v2997_v41  ;;  %1849 = vmatprep.subr.bf16.mxu1 %v3000_v42  ;;  %v3079_v41 = vld [vmem:[#allocation2 + $0x4c0] ss:$16 sps:$4 sm:$0xff]   ;;  %v3082_v42 = vld [vmem:[#allocation2 + $0x4c8] ss:$16 sps:$4 sm:$0xff]  }
  0x88   :  { %1678 = vmatpush1.bf16.msra.mxu0 %v2995_v43  ;;  %1850 = vmatpush1.bf16.msra.mxu1 %v2998_v44  ;;  %v3087_v43 = vld [vmem:[#allocation2 + $0x4e4] ss:$16 sps:$4 sm:$0xff]   ;;  %v3090_v44 = vld [vmem:[#allocation2 + $0x4ec] ss:$16 sps:$4 sm:$0xff]  }
  0x89   :  { %1679 = vmatprep.subr.bf16.mxu0 %v3003_v45  ;;  %1851 = vmatprep.subr.bf16.mxu1 %v3006_v46  ;;  %v3085_v45 = vld [vmem:[#allocation2 + $0x4e0] ss:$16 sps:$4 sm:$0xff]   ;;  %v3088_v46 = vld [vmem:[#allocation2 + $0x4e8] ss:$16 sps:$4 sm:$0xff]  }
  0x8c   :  { %1680 = vmatpush1.bf16.msra.mxu0 %v3001_v47  ;;  %1852 = vmatpush1.bf16.msra.mxu1 %v3004_v48  ;;  %v3093_v47 = vld [vmem:[#allocation2 + $0x504] ss:$16 sps:$4 sm:$0xff]   ;;  %v3096_v48 = vld [vmem:[#allocation2 + $0x50c] ss:$16 sps:$4 sm:$0xff]  }
  0x8d   :  { %1681 = vmatprep.subr.bf16.mxu0 %v3009_v49  ;;  %1853 = vmatprep.subr.bf16.mxu1 %v3012_v50  ;;  %v3091_v49 = vld [vmem:[#allocation2 + $0x500] ss:$16 sps:$4 sm:$0xff]   ;;  %v3094_v50 = vld [vmem:[#allocation2 + $0x508] ss:$16 sps:$4 sm:$0xff]  }
  0x90   :  { %1682 = vmatpush1.bf16.msra.mxu0 %v3007_v51  ;;  %1854 = vmatpush1.bf16.msra.mxu1 %v3010_v52  ;;  %v3099_v51 = vld [vmem:[#allocation2 + $0x524] ss:$16 sps:$4 sm:$0xff]   ;;  %v3102_v52 = vld [vmem:[#allocation2 + $0x52c] ss:$16 sps:$4 sm:$0xff]  }
  0x91   :  { %1683 = vmatprep.subr.bf16.mxu0 %v3015_v53  ;;  %1855 = vmatprep.subr.bf16.mxu1 %v3018_v54  ;;  %v3097_v53 = vld [vmem:[#allocation2 + $0x520] ss:$16 sps:$4 sm:$0xff]   ;;  %v3100_v54 = vld [vmem:[#allocation2 + $0x528] ss:$16 sps:$4 sm:$0xff]  }
  0x94   :  { %1684 = vmatpush1.bf16.msra.mxu0 %v3013_v55  ;;  %1856 = vmatpush1.bf16.msra.mxu1 %v3016_v56  ;;  %v3105_v55 = vld [vmem:[#allocation2 + $0x544] ss:$16 sps:$4 sm:$0xff]   ;;  %v3108_v56 = vld [vmem:[#allocation2 + $0x54c] ss:$16 sps:$4 sm:$0xff]  }
  0x95   :  { %1685 = vmatprep.subr.bf16.mxu0 %v3021_v57  ;;  %1857 = vmatprep.subr.bf16.mxu1 %v3024_v58  ;;  %v3103_v57 = vld [vmem:[#allocation2 + $0x540] ss:$16 sps:$4 sm:$0xff]   ;;  %v3106_v58 = vld [vmem:[#allocation2 + $0x548] ss:$16 sps:$4 sm:$0xff]  }
  0x98   :  { %1686 = vmatpush1.bf16.msra.mxu0 %v3019_v59  ;;  %1858 = vmatpush1.bf16.msra.mxu1 %v3022_v60  ;;  %v3111_v59 = vld [vmem:[#allocation2 + $0x564] ss:$16 sps:$4 sm:$0xff]   ;;  %v3114_v60 = vld [vmem:[#allocation2 + $0x56c] ss:$16 sps:$4 sm:$0xff]  }
  0x99   :  { %1687 = vmatprep.subr.bf16.mxu0 %v3027_v61  ;;  %1859 = vmatprep.subr.bf16.mxu1 %v3030_v62  ;;  %v3109_v61 = vld [vmem:[#allocation2 + $0x560] ss:$16 sps:$4 sm:$0xff]   ;;  %v3112_v62 = vld [vmem:[#allocation2 + $0x568] ss:$16 sps:$4 sm:$0xff]  }
  0x9c   :  { %1688 = vmatpush1.bf16.msra.mxu0 %v3025_v63  ;;  %1860 = vmatpush1.bf16.msra.mxu1 %v3028_v0  ;;  %v3117_v63 = vld [vmem:[#allocation2 + $0x584] ss:$16 sps:$4 sm:$0xff]   ;;  %v3120_v0 = vld [vmem:[#allocation2 + $0x58c] ss:$16 sps:$4 sm:$0xff]  }
  0x9d   :  { %1689 = vmatprep.subr.bf16.mxu0 %v3033_v1  ;;  %1861 = vmatprep.subr.bf16.mxu1 %v3036_v2  ;;  %v3115_v1 = vld [vmem:[#allocation2 + $0x580] ss:$16 sps:$4 sm:$0xff]   ;;  %v3118_v2 = vld [vmem:[#allocation2 + $0x588] ss:$16 sps:$4 sm:$0xff]  }
  0xa0   :  { %1690 = vmatpush1.bf16.msra.mxu0 %v3031_v3  ;;  %1862 = vmatpush1.bf16.msra.mxu1 %v3034_v4  ;;  %v3123_v3 = vld [vmem:[#allocation2 + $0x5a4] ss:$16 sps:$4 sm:$0xff]   ;;  %v3126_v4 = vld [vmem:[#allocation2 + $0x5ac] ss:$16 sps:$4 sm:$0xff]  }
  0xa1   :  { %1691 = vmatprep.subr.bf16.mxu0 %v3039_v5  ;;  %1863 = vmatprep.subr.bf16.mxu1 %v3042_v6  ;;  %v3121_v5 = vld [vmem:[#allocation2 + $0x5a0] ss:$16 sps:$4 sm:$0xff]   ;;  %v3124_v6 = vld [vmem:[#allocation2 + $0x5a8] ss:$16 sps:$4 sm:$0xff]  }
  0xa4   :  { %1692 = vmatpush1.bf16.msra.mxu0 %v3037_v7  ;;  %1864 = vmatpush1.bf16.msra.mxu1 %v3040_v8  ;;  %v3129_v7 = vld [vmem:[#allocation2 + $0x5c4] ss:$16 sps:$4 sm:$0xff]   ;;  %v3132_v8 = vld [vmem:[#allocation2 + $0x5cc] ss:$16 sps:$4 sm:$0xff]  }
  0xa5   :  { %1704 = vmatprep.subr.bf16.mxu0 %v3045_v9  ;;  %1876 = vmatprep.subr.bf16.mxu1 %v3048_v12  ;;  %v3127_v9 = vld [vmem:[#allocation2 + $0x5c0] ss:$16 sps:$4 sm:$0xff]   ;;  %v3138_v12 = vld [vmem:[#allocation2 + $0x5ec] ss:$16 sps:$4 sm:$0xff]  }
  0xa7   :  { %1694 = vmatmul.mubr.bf16.vlgmr.msra.gmra.mrb[0].mxu0 %v73_v15  ;;  %1866 = vmatmul.mubr.bf16.vlgmr.msra.gmra.mrb[0].mxu1 %v73_v15  ;;  %v3141_v15 = vld [vmem:[#allocation2 + $0x604] ss:$16 sps:$4 sm:$0xff]  }
  0xa8   :  { %1705 = vmatpush1.bf16.msra.mxu0 %v3043_v13  ;;  %1877 = vmatpush1.bf16.msra.mxu1 %v3046_v14  ;;  %v3133_v13 = vld [vmem:[#allocation2 + $0x5e0] ss:$16 sps:$4 sm:$0xff]   ;;  %v3136_v14 = vld [vmem:[#allocation2 + $0x5e8] ss:$16 sps:$4 sm:$0xff]  }
  0xa9   :  { %1706 = vmatprep.subr.bf16.mxu0 %v3051_v16  ;;  %1878 = vmatprep.subr.bf16.mxu1 %v3054_v17  ;;  %v59_v16 = vld [vmem:[%s3485_s0 + $0x20] sm:$0xff] }
  0xaa   :  { %1736 = vmatprep.mubr.bf16.mxu0 %v76_v22  ;;  %1908 = vmatprep.mubr.bf16.mxu1 %v76_v22  ;;  %v67_v17 = vld [vmem:[%s3485_s0 + $0x60] sm:$0xff]  ;;  %v70_v22 = vld [vmem:[%s3485_s0 + $0x78] sm:$0xff] }
  0xac   :  { %1707 = vmatpush1.bf16.msra.mxu0 %v3049_v20  ;;  %1879 = vmatpush1.bf16.msra.mxu1 %v3052_v21  ;;  %v62_v20 = vld [vmem:[%s3485_s0 + $0x38] sm:$0xff]  ;;  %v75_v21 = vpack.c.bf16 %v67_v17, %v59_v16 }
  0xad   :  { %1708 = vmatprep.subr.bf16.mxu0 %v3057_v23  ;;  %1880 = vmatprep.subr.bf16.mxu1 %v3060_v24  ;;  %v3142_v23 = vld [vmem:[#allocation2 + $0x608] ss:$16 sps:$4 sm:$0xff]   ;;  %v3147_v24 = vld [vmem:[#allocation2 + $0x624] ss:$16 sps:$4 sm:$0xff]  }
  0xb0   :  { %1709 = vmatpush1.bf16.msra.mxu0 %v3055_v25  ;;  %1881 = vmatpush1.bf16.msra.mxu1 %v3058_v26  ;;  %v3150_v25 = vld [vmem:[#allocation2 + $0x62c] ss:$16 sps:$4 sm:$0xff]   ;;  %v3145_v26 = vld [vmem:[#allocation2 + $0x620] ss:$16 sps:$4 sm:$0xff]  }
  0xb1   :  { %1710 = vmatprep.subr.bf16.mxu0 %v3063_v27  ;;  %1882 = vmatprep.subr.bf16.mxu1 %v3066_v28  ;;  %v3148_v27 = vld [vmem:[#allocation2 + $0x628] ss:$16 sps:$4 sm:$0xff]   ;;  %v78_v28 = vpack.c.bf16 %v70_v22, %v62_v20  ;;  %v69_v20 = vld [vmem:[%s3485_s0 + $0x70] sm:$0xff] }
  0xb4   :  { %1711 = vmatpush1.bf16.msra.mxu0 %v3061_v29  ;;  %1883 = vmatpush1.bf16.msra.mxu1 %v3064_v30  ;;  %v3153_v29 = vld [vmem:[#allocation2 + $0x644] ss:$16 sps:$4 sm:$0xff]   ;;  %v3156_v30 = vld [vmem:[#allocation2 + $0x64c] ss:$16 sps:$4 sm:$0xff]  }
  0xb5   :  { %1712 = vmatprep.subr.bf16.mxu0 %v3069_v31  ;;  %1884 = vmatprep.subr.bf16.mxu1 %v3072_v32  ;;  %v3151_v31 = vld [vmem:[#allocation2 + $0x640] ss:$16 sps:$4 sm:$0xff]   ;;  %v3154_v32 = vld [vmem:[#allocation2 + $0x648] ss:$16 sps:$4 sm:$0xff]  }
  0xb8   :  { %1713 = vmatpush1.bf16.msra.mxu0 %v3067_v33  ;;  %1885 = vmatpush1.bf16.msra.mxu1 %v3070_v34  ;;  %v3159_v33 = vld [vmem:[#allocation2 + $0x664] ss:$16 sps:$4 sm:$0xff]   ;;  %v3162_v34 = vld [vmem:[#allocation2 + $0x66c] ss:$16 sps:$4 sm:$0xff]  }
  0xb9   :  { %1714 = vmatprep.subr.bf16.mxu0 %v3075_v35  ;;  %1886 = vmatprep.subr.bf16.mxu1 %v3078_v36  ;;  %v3157_v35 = vld [vmem:[#allocation2 + $0x660] ss:$16 sps:$4 sm:$0xff]   ;;  %v3160_v36 = vld [vmem:[#allocation2 + $0x668] ss:$16 sps:$4 sm:$0xff]  }
  0xbc   :  { %1715 = vmatpush1.bf16.msra.mxu0 %v3073_v37  ;;  %1887 = vmatpush1.bf16.msra.mxu1 %v3076_v38  ;;  %v3165_v37 = vld [vmem:[#allocation2 + $0x684] ss:$16 sps:$4 sm:$0xff]   ;;  %v3168_v38 = vld [vmem:[#allocation2 + $0x68c] ss:$16 sps:$4 sm:$0xff]  }
  0xbd   :  { %1716 = vmatprep.subr.bf16.mxu0 %v3081_v39  ;;  %1888 = vmatprep.subr.bf16.mxu1 %v3084_v40  ;;  %v3163_v39 = vld [vmem:[#allocation2 + $0x680] ss:$16 sps:$4 sm:$0xff]   ;;  %v3166_v40 = vld [vmem:[#allocation2 + $0x688] ss:$16 sps:$4 sm:$0xff]  }
  0xc0   :  { %1717 = vmatpush1.bf16.msra.mxu0 %v3079_v41  ;;  %1889 = vmatpush1.bf16.msra.mxu1 %v3082_v42  ;;  %v3171_v41 = vld [vmem:[#allocation2 + $0x6a4] ss:$16 sps:$4 sm:$0xff]   ;;  %v3174_v42 = vld [vmem:[#allocation2 + $0x6ac] ss:$16 sps:$4 sm:$0xff]  }
  0xc1   :  { %1718 = vmatprep.subr.bf16.mxu0 %v3087_v43  ;;  %1890 = vmatprep.subr.bf16.mxu1 %v3090_v44  ;;  %v3169_v43 = vld [vmem:[#allocation2 + $0x6a0] ss:$16 sps:$4 sm:$0xff]   ;;  %v3172_v44 = vld [vmem:[#allocation2 + $0x6a8] ss:$16 sps:$4 sm:$0xff]  }
  0xc4   :  { %1719 = vmatpush1.bf16.msra.mxu0 %v3085_v45  ;;  %1891 = vmatpush1.bf16.msra.mxu1 %v3088_v46  ;;  %v3177_v45 = vld [vmem:[#allocation2 + $0x6c4] ss:$16 sps:$4 sm:$0xff]   ;;  %v3180_v46 = vld [vmem:[#allocation2 + $0x6cc] ss:$16 sps:$4 sm:$0xff]  }
  0xc5   :  { %1720 = vmatprep.subr.bf16.mxu0 %v3093_v47  ;;  %1892 = vmatprep.subr.bf16.mxu1 %v3096_v48  ;;  %v3175_v47 = vld [vmem:[#allocation2 + $0x6c0] ss:$16 sps:$4 sm:$0xff]   ;;  %v3178_v48 = vld [vmem:[#allocation2 + $0x6c8] ss:$16 sps:$4 sm:$0xff]  }
  0xc8   :  { %1721 = vmatpush1.bf16.msra.mxu0 %v3091_v49  ;;  %1893 = vmatpush1.bf16.msra.mxu1 %v3094_v50  ;;  %v3183_v49 = vld [vmem:[#allocation2 + $0x6e4] ss:$16 sps:$4 sm:$0xff]   ;;  %v3186_v50 = vld [vmem:[#allocation2 + $0x6ec] ss:$16 sps:$4 sm:$0xff]  }
  0xc9   :  { %1722 = vmatprep.subr.bf16.mxu0 %v3099_v51  ;;  %1894 = vmatprep.subr.bf16.mxu1 %v3102_v52  ;;  %v3181_v51 = vld [vmem:[#allocation2 + $0x6e0] ss:$16 sps:$4 sm:$0xff]   ;;  %v3184_v52 = vld [vmem:[#allocation2 + $0x6e8] ss:$16 sps:$4 sm:$0xff]  }
  0xcc   :  { %1723 = vmatpush1.bf16.msra.mxu0 %v3097_v53  ;;  %1895 = vmatpush1.bf16.msra.mxu1 %v3100_v54  ;;  %v3189_v53 = vld [vmem:[#allocation2 + $0x704] ss:$16 sps:$4 sm:$0xff]   ;;  %v3192_v54 = vld [vmem:[#allocation2 + $0x70c] ss:$16 sps:$4 sm:$0xff]  }
  0xcd   :  { %1724 = vmatprep.subr.bf16.mxu0 %v3105_v55  ;;  %1896 = vmatprep.subr.bf16.mxu1 %v3108_v56  ;;  %v3187_v55 = vld [vmem:[#allocation2 + $0x700] ss:$16 sps:$4 sm:$0xff]   ;;  %v3190_v56 = vld [vmem:[#allocation2 + $0x708] ss:$16 sps:$4 sm:$0xff]  }
  0xd0   :  { %1725 = vmatpush1.bf16.msra.mxu0 %v3103_v57  ;;  %1897 = vmatpush1.bf16.msra.mxu1 %v3106_v58  ;;  %v3195_v57 = vld [vmem:[#allocation2 + $0x724] ss:$16 sps:$4 sm:$0xff]   ;;  %v3198_v58 = vld [vmem:[#allocation2 + $0x72c] ss:$16 sps:$4 sm:$0xff]  }
  0xd1   :  { %1726 = vmatprep.subr.bf16.mxu0 %v3111_v59  ;;  %1898 = vmatprep.subr.bf16.mxu1 %v3114_v60  ;;  %v3193_v59 = vld [vmem:[#allocation2 + $0x720] ss:$16 sps:$4 sm:$0xff]   ;;  %v3196_v60 = vld [vmem:[#allocation2 + $0x728] ss:$16 sps:$4 sm:$0xff]  }
  0xd4   :  { %1727 = vmatpush1.bf16.msra.mxu0 %v3109_v61  ;;  %1899 = vmatpush1.bf16.msra.mxu1 %v3112_v62  ;;  %v3201_v61 = vld [vmem:[#allocation2 + $0x744] ss:$16 sps:$4 sm:$0xff]   ;;  %v3204_v62 = vld [vmem:[#allocation2 + $0x74c] ss:$16 sps:$4 sm:$0xff]  }
  0xd5   :  { %1728 = vmatprep.subr.bf16.mxu0 %v3117_v63  ;;  %1900 = vmatprep.subr.bf16.mxu1 %v3120_v0  ;;  %v3199_v63 = vld [vmem:[#allocation2 + $0x740] ss:$16 sps:$4 sm:$0xff]   ;;  %v3202_v0 = vld [vmem:[#allocation2 + $0x748] ss:$16 sps:$4 sm:$0xff]  }
  0xd8   :  { %1729 = vmatpush1.bf16.msra.mxu0 %v3115_v1  ;;  %1901 = vmatpush1.bf16.msra.mxu1 %v3118_v2  ;;  %v3207_v1 = vld [vmem:[#allocation2 + $0x764] ss:$16 sps:$4 sm:$0xff]   ;;  %v3210_v2 = vld [vmem:[#allocation2 + $0x76c] ss:$16 sps:$4 sm:$0xff]  }
  0xd9   :  { %1730 = vmatprep.subr.bf16.mxu0 %v3123_v3  ;;  %1902 = vmatprep.subr.bf16.mxu1 %v3126_v4  ;;  %v3205_v3 = vld [vmem:[#allocation2 + $0x760] ss:$16 sps:$4 sm:$0xff]   ;;  %v3208_v4 = vld [vmem:[#allocation2 + $0x768] ss:$16 sps:$4 sm:$0xff]  }
  0xdc   :  { %1731 = vmatpush1.bf16.msra.mxu0 %v3121_v5  ;;  %1903 = vmatpush1.bf16.msra.mxu1 %v3124_v6  ;;  %v3213_v5 = vld [vmem:[#allocation2 + $0x784] ss:$16 sps:$4 sm:$0xff]   ;;  %v3216_v6 = vld [vmem:[#allocation2 + $0x78c] ss:$16 sps:$4 sm:$0xff]  }
  0xdd   :  { %1732 = vmatprep.subr.bf16.mxu0 %v3129_v7  ;;  %1904 = vmatprep.subr.bf16.mxu1 %v3132_v8  ;;  %v3211_v7 = vld [vmem:[#allocation2 + $0x780] ss:$16 sps:$4 sm:$0xff]   ;;  %v3214_v8 = vld [vmem:[#allocation2 + $0x788] ss:$16 sps:$4 sm:$0xff]  }
  0xe0   :  { %1733 = vmatpush1.bf16.msra.mxu0 %v3127_v9  ;;  %1905 = vmatpush1.bf16.msra.mxu1 %v3130_v10  ;;  %v3219_v9 = vld [vmem:[#allocation2 + $0x7a4] ss:$16 sps:$4 sm:$0xff]   ;;  %v3222_v10 = vld [vmem:[#allocation2 + $0x7ac] ss:$16 sps:$4 sm:$0xff]  }
  0xe1   :  { %1734 = vmatprep.subr.bf16.mxu0 %v3135_v11  ;;  %1906 = vmatprep.subr.bf16.mxu1 %v3138_v12  ;;  %v327_v11 = vld [vmem:[#allocation2 + $0x7c0] sm:$0xff]  ;;  %v328_v12 = vld [vmem:[#allocation2 + $0x7c8] sm:$0xff] }
  0xe2   :  { %v2691_v16 = vcombine.high %v328_v12, %v328_v12  ;;  %v2688_v17 = vcombine.low %v327_v11, %v327_v11 }
  0xe4   :  { %1735 = vmatpush1.bf16.msra.mxu0 %v3133_v13  ;;  %1907 = vmatpush1.bf16.msra.mxu1 %v3136_v14  ;;  %v3217_v13 = vld [vmem:[#allocation2 + $0x7a0] ss:$16 sps:$4 sm:$0xff]   ;;  %v3220_v14 = vld [vmem:[#allocation2 + $0x7a8] ss:$16 sps:$4 sm:$0xff]  }
  0xe5   :  { %1747 = vmatprep.subr.bf16.mxu0 %v3141_v15  ;;  %1919 = vmatprep.subr.bf16.mxu1 %v3144_v18  ;;  %v2689_v15 = vcombine.high %v327_v11, %v327_v11  ;;  %v2690_v18 = vcombine.low %v328_v12, %v328_v12 }
  0xe7   :  { %1737 = vmatmul.mubr.bf16.vlgmr.msra.gmra.mrb[0].mxu0 %v75_v21  ;;  %1909 = vmatmul.mubr.bf16.vlgmr.msra.gmra.mrb[0].mxu1 %v75_v21  ;;  %v1607_v21 = vsel %vm1605_vm1, %v2688_v17, 0  ;;  %v1613_v22 = vsel %vm1605_vm1, %v2690_v18, 0 }
  0xe8   :  { %1748 = vmatpush1.bf16.msra.mxu0 %v3139_v19  ;;  %1920 = vmatpush1.bf16.msra.mxu1 %v3142_v23  ;;  %v61_v19 = vld [vmem:[%s3485_s0 + $0x30] sm:$0xff] }
  0xe9   :  { %1749 = vmatprep.subr.bf16.mxu0 %v3147_v24  ;;  %1921 = vmatprep.subr.bf16.mxu1 %v3150_v25  ;;  %v3227_v23 = vld [vmem:[#allocation4 + $0x40] sm:$0xff]   ;;  %v77_v25 = vpack.c.bf16 %v69_v20, %v61_v19 }
  0xea   :  { %2693 = vmatprep.mubr.msk.bf16.mxu0 %vm1601_vm0, %v78_v28  ;;  %2695 = vmatprep.mubr.msk.bf16.mxu1 %vm1601_vm0, %v78_v28  ;;  %v3228_v24 = vld [vmem:[#allocation4 + $0xc0] sm:$0xff]   ;;  %v3231_v28 = vld [vmem:[#allocation4 + $0x48] sm:$0xff]  }
  0xec   :  { %1750 = vmatpush1.bf16.msra.mxu0 %v3145_v26  ;;  %1922 = vmatpush1.bf16.msra.mxu1 %v3148_v27  ;;  %v3229_v26 = vld [vmem:[#allocation4] sm:$0xff]  }
  0xed   :  { %1751 = vmatprep.subr.bf16.mxu0 %v3153_v29  ;;  %1923 = vmatprep.subr.bf16.mxu1 %v3156_v30  ;;  %v3230_v27 = vld [vmem:[#allocation4 + $0x80] sm:$0xff]   ;;  %v3232_v29 = vld [vmem:[#allocation4 + $0xc8] sm:$0xff]  }
  0xee   :  { %v3233_v30 = vld [vmem:[#allocation4 + $0x8] sm:$0xff]  }
  0xf0   :  { %1752 = vmatpush1.bf16.msra.mxu0 %v3151_v31  ;;  %1924 = vmatpush1.bf16.msra.mxu1 %v3154_v32  ;;  %v3234_v31 = vld [vmem:[#allocation4 + $0x88] sm:$0xff]   ;;  %v3235_v32 = vld [vmem:[#allocation4 + $0x50] sm:$0xff]  }
  0xf1   :  { %1753 = vmatprep.subr.bf16.mxu0 %v3159_v33  ;;  %1925 = vmatprep.subr.bf16.mxu1 %v3162_v34  ;;  %v3236_v33 = vld [vmem:[#allocation4 + $0xd0] sm:$0xff]  }
  0xf2   :  { %v3237_v34 = vld [vmem:[#allocation4 + $0x10] sm:$0xff]  }
  0xf4   :  { %1754 = vmatpush1.bf16.msra.mxu0 %v3157_v35  ;;  %1926 = vmatpush1.bf16.msra.mxu1 %v3160_v36  ;;  %v3238_v35 = vld [vmem:[#allocation4 + $0x90] sm:$0xff]   ;;  %v3239_v36 = vld [vmem:[#allocation4 + $0x58] sm:$0xff]  }
  0xf5   :  { %1755 = vmatprep.subr.bf16.mxu0 %v3165_v37  ;;  %1927 = vmatprep.subr.bf16.mxu1 %v3168_v38  ;;  %v3240_v37 = vld [vmem:[#allocation4 + $0xd8] sm:$0xff]  }
  0xf6   :  { %v3241_v38 = vld [vmem:[#allocation4 + $0x18] sm:$0xff]  }
  0xf8   :  { %1756 = vmatpush1.bf16.msra.mxu0 %v3163_v39  ;;  %1928 = vmatpush1.bf16.msra.mxu1 %v3166_v40  ;;  %v3242_v39 = vld [vmem:[#allocation4 + $0x98] sm:$0xff]   ;;  %v3243_v40 = vld [vmem:[#allocation4 + $0x60] sm:$0xff]  }
  0xf9   :  { %1757 = vmatprep.subr.bf16.mxu0 %v3171_v41  ;;  %1929 = vmatprep.subr.bf16.mxu1 %v3174_v42  ;;  %v3244_v41 = vld [vmem:[#allocation4 + $0xe0] sm:$0xff]  }
  0xfa   :  { %v3245_v42 = vld [vmem:[#allocation4 + $0x20] sm:$0xff]  }
  0xfc   :  { %1758 = vmatpush1.bf16.msra.mxu0 %v3169_v43  ;;  %1930 = vmatpush1.bf16.msra.mxu1 %v3172_v44  ;;  %v3246_v43 = vld [vmem:[#allocation4 + $0xa0] sm:$0xff]   ;;  %v3247_v44 = vld [vmem:[#allocation4 + $0x68] sm:$0xff]  }
  0xfd   :  { %1759 = vmatprep.subr.bf16.mxu0 %v3177_v45  ;;  %1931 = vmatprep.subr.bf16.mxu1 %v3180_v46  ;;  %v3248_v45 = vld [vmem:[#allocation4 + $0xe8] sm:$0xff]  }
  0xfe   :  { %v3249_v46 = vld [vmem:[#allocation4 + $0x28] sm:$0xff]  }
 0x100   :  { %1760 = vmatpush1.bf16.msra.mxu0 %v3175_v47  ;;  %1932 = vmatpush1.bf16.msra.mxu1 %v3178_v48  ;;  %v3250_v47 = vld [vmem:[#allocation4 + $0xa8] sm:$0xff]   ;;  %v3251_v48 = vld [vmem:[#allocation4 + $0x70] sm:$0xff]  }
 0x101   :  { %1761 = vmatprep.subr.bf16.mxu0 %v3183_v49  ;;  %1933 = vmatprep.subr.bf16.mxu1 %v3186_v50  ;;  %v3252_v49 = vld [vmem:[#allocation4 + $0xf0] sm:$0xff]  }
 0x102   :  { %v3253_v50 = vld [vmem:[#allocation4 + $0x30] sm:$0xff]  }
 0x104   :  { %1762 = vmatpush1.bf16.msra.mxu0 %v3181_v51  ;;  %1934 = vmatpush1.bf16.msra.mxu1 %v3184_v52  ;;  %v3254_v51 = vld [vmem:[#allocation4 + $0xb0] sm:$0xff]   ;;  %v3255_v52 = vld [vmem:[#allocation4 + $0x78] sm:$0xff]  }
 0x105   :  { %1763 = vmatprep.subr.bf16.mxu0 %v3189_v53  ;;  %1935 = vmatprep.subr.bf16.mxu1 %v3192_v54  ;;  %v3256_v53 = vld [vmem:[#allocation4 + $0xf8] sm:$0xff]  }
 0x106   :  { %v3257_v54 = vld [vmem:[#allocation4 + $0x38] sm:$0xff]  }
 0x108   :  { %1764 = vmatpush1.bf16.msra.mxu0 %v3187_v55  ;;  %1936 = vmatpush1.bf16.msra.mxu1 %v3190_v56  ;;  %v3258_v55 = vld [vmem:[#allocation4 + $0xb8] sm:$0xff]   ;;  %v3321_v56 = vmov 0.0  }
 0x109   :  { %1765 = vmatprep.subr.bf16.mxu0 %v3195_v57  ;;  %1937 = vmatprep.subr.bf16.mxu1 %v3198_v58  ;;  %v331_v57 = vlaneseq }
 0x10b   :  { %v332_v58 = vshrl.u32 %v331_v57, 7 }
 0x10c   :  { %1766 = vmatpush1.bf16.msra.mxu0 %v3193_v59  ;;  %1938 = vmatpush1.bf16.msra.mxu1 %v3196_v60 }
 0x10d   :  { %1767 = vmatprep.subr.bf16.mxu0 %v3201_v61  ;;  %1939 = vmatprep.subr.bf16.mxu1 %v3204_v62  ;;  %v333_v59 = vsub.s32 0, %v332_v58  ;;  %v341_v60 = vsub.s32 2, %v332_v58  ;;  %v329_v61 = vld [vmem:[%s3487_s2] sm:$0xf]  ;;  %v337_v62 = vsub.s32 1, %v332_v58 }
 0x110   :  { %1768 = vmatpush1.bf16.msra.mxu0 %v3199_v63  ;;  %1940 = vmatpush1.bf16.msra.mxu1 %v3202_v0  ;;  %v345_v63 = vsub.s32 3, %v332_v58  ;;  %v334_v0 = vrot.slane %v329_v61, %v333_v59  ;;  %v2729_v58 = vld [vmem:[%s3491_s6] ss:$0 sm:$0xff] }
 0x111   :  { %1769 = vmatprep.subr.bf16.mxu0 %v3207_v1  ;;  %1941 = vmatprep.subr.bf16.mxu1 %v3210_v2  ;;  %v342_v1 = vrot.slane %v329_v61, %v341_v60  ;;  %v338_v2 = vrot.slane %v329_v61, %v337_v62 }
 0x114   :  { %1770 = vmatpush1.bf16.msra.mxu0 %v3205_v3  ;;  %1942 = vmatpush1.bf16.msra.mxu1 %v3208_v4  ;;  %v346_v3 = vrot.slane %v329_v61, %v345_v63 }
 0x115   :  { %1771 = vmatprep.subr.bf16.mxu0 %v3213_v5  ;;  %1943 = vmatprep.subr.bf16.mxu1 %v3216_v6 }
 0x118   :  { %1772 = vmatpush1.bf16.msra.mxu0 %v3211_v7  ;;  %1944 = vmatpush1.bf16.msra.mxu1 %v3214_v8 }
 0x119   :  { %1773 = vmatprep.subr.bf16.mxu0 %v3219_v9  ;;  %1945 = vmatprep.subr.bf16.mxu1 %v3222_v10 }
 0x11c   :  { %1774 = vmatpush1.bf16.msra.mxu0 %v3217_v13  ;;  %1946 = vmatpush1.bf16.msra.mxu1 %v3220_v14 }
 0x11d   :  { %2692 = vmatprep.subr.msk.bf16.mxu0 %vm1605_vm1, %v2689_v15  ;;  %2694 = vmatprep.subr.msk.bf16.mxu1 %vm1605_vm1, %v2691_v16 }
 0x120   :  { %1776 = vmatpush1.bf16.msra.mxu0 %v1607_v21  ;;  %1948 = vmatpush1.bf16.msra.mxu1 %v1613_v22 }
 0x121   :  { %2738 = vmatprep.subr.bf16.mxu0 %v3227_v23  ;;  %2760 = vmatprep.subr.bf16.mxu1 %v3228_v24 }
 0x123   :  { %1780 = vmatmul.mubr.bf16.vlgmr.msra.gmra.mrb[0].mxu0 %v77_v25  ;;  %1952 = vmatmul.mubr.bf16.vlgmr.msra.gmra.mrb[0].mxu1 %v77_v25 }
 0x124   :  { %2739 = vmatpush3.bf16.msra.mxu0 %v3229_v26  ;;  %2761 = vmatpush3.bf16.msra.mxu1 %v3230_v27 }
 0x125   :  { %2740 = vmatprep.subr.bf16.mxu0 %v3231_v28  ;;  %2762 = vmatprep.subr.bf16.mxu1 %v3232_v29 }
 0x128   :  { %2741 = vmatpush3.bf16.msra.mxu0 %v3233_v30  ;;  %2763 = vmatpush3.bf16.msra.mxu1 %v3234_v31 }
 0x129   :  { %2742 = vmatprep.subr.bf16.mxu0 %v3235_v32  ;;  %2764 = vmatprep.subr.bf16.mxu1 %v3236_v33  ;;  %v3259_v32 = vld [vmem:[%s3490_s5] sm:$0xff]   ;;  %v3260_v33 = vld [vmem:[%s3490_s5 + $0x8] sm:$0xff]  }
 0x12c   :  { %2743 = vmatpush3.bf16.msra.mxu0 %v3237_v34  ;;  %2765 = vmatpush3.bf16.msra.mxu1 %v3238_v35  ;;  %v3261_v34 = vld [vmem:[%s3490_s5 + $0x10] sm:$0xff]   ;;  %v3262_v35 = vld [vmem:[%s3490_s5 + $0x18] sm:$0xff]  }
 0x12d   :  { %2744 = vmatprep.subr.bf16.mxu0 %v3239_v36  ;;  %2766 = vmatprep.subr.bf16.mxu1 %v3240_v37  ;;  %v3263_v36 = vld [vmem:[%s3490_s5 + $0x20] sm:$0xff]   ;;  %v3264_v37 = vld [vmem:[%s3490_s5 + $0x28] sm:$0xff]  }
 0x130   :  { %2745 = vmatpush3.bf16.msra.mxu0 %v3241_v38  ;;  %2767 = vmatpush3.bf16.msra.mxu1 %v3242_v39  ;;  %v3265_v38 = vld [vmem:[%s3490_s5 + $0x30] sm:$0xff]   ;;  %v3266_v39 = vld [vmem:[%s3490_s5 + $0x38] sm:$0xff]  }
 0x131   :  { %2746 = vmatprep.subr.bf16.mxu0 %v3243_v40  ;;  %2768 = vmatprep.subr.bf16.mxu1 %v3244_v41 }
 0x134   :  { %2747 = vmatpush3.bf16.msra.mxu0 %v3245_v42  ;;  %2769 = vmatpush3.bf16.msra.mxu1 %v3246_v43  ;;  %v2696_v42 = vld [vmem:[%s3489_s4] ss:$0 sm:$0xff] }
 0x135   :  { %2748 = vmatprep.subr.bf16.mxu0 %v3247_v44  ;;  %2770 = vmatprep.subr.bf16.mxu1 %v3248_v45 }
 0x138   :  { %2749 = vmatpush3.bf16.msra.mxu0 %v3249_v46  ;;  %2771 = vmatpush3.bf16.msra.mxu1 %v3250_v47 }
 0x139   :  { %2750 = vmatprep.subr.bf16.mxu0 %v3251_v48  ;;  %2772 = vmatprep.subr.bf16.mxu1 %v3252_v49 }
 0x13c   :  { %2751 = vmatpush3.bf16.msra.mxu0 %v3253_v50  ;;  %2773 = vmatpush3.bf16.msra.mxu1 %v3254_v51 }
 0x13d   :  { %2752 = vmatprep.subr.bf16.mxu0 %v3255_v52  ;;  %2774 = vmatprep.subr.bf16.mxu1 %v3256_v53 }
 0x140   :  { %2753 = vmatpush3.bf16.msra.mxu0 %v3257_v54  ;;  %2775 = vmatpush3.bf16.msra.mxu1 %v3258_v55 }
 0x141   :  { %2791 = vmatprep.subr.bf16.mxu0 %v3321_v56 }
 0x1f6   :  { %v1781_v4 = vpop.f32.mrb[0].mxu0  ;;  %v1953_v5 = vpop.f32.mrb[0].mxu1 }
 0x1f7   :  { %v2811_v6 = vadd.f32 %v1781_v4, %v334_v0  ;;  %v2815_v7 = vadd.f32 %v1953_v5, %v342_v1  ;;  %v1783_v8 = vpop.f32.mrb[1].mxu0  ;;  %v1955_v9 = vpop.f32.mrb[1].mxu1 }
 0x1f8   :  { %v2812_v10 = vadd.f32 %v1783_v8, %v338_v2  ;;  %v2816_v11 = vadd.f32 %v1955_v9, %v346_v3  ;;  %v1785_v12 = vpop.f32.mrb[2].mxu0  ;;  %v1957_v13 = vpop.f32.mrb[2].mxu1 }
 0x1f9   :  { %v2813_v14 = vadd.f32 %v1785_v12, %v334_v0  ;;  %v2817_v15 = vadd.f32 %v1957_v13, %v342_v1  ;;  %v1787_v16 = vpop.f32.mrb[3].mxu0  ;;  %v1959_v17 = vpop.f32.mrb[3].mxu1  ;;  %v1962_v20 = vmax.f32 %v2811_v6, 0.0  ;;  %v1964_v21 = vmax.f32 %v2815_v7, 0.0 }
 0x1fa   :  { %v2814_v18 = vadd.f32 %v1787_v16, %v338_v2  ;;  %v2818_v19 = vadd.f32 %v1959_v17, %v346_v3  ;;  %v1963_v24 = vmax.f32 %v2812_v10, 0.0  ;;  %v1965_v25 = vmax.f32 %v2816_v11, 0.0 }
 0x1fb   :  { %v1966_v22 = vmax.f32 %v2813_v14, 0.0  ;;  %v1968_v23 = vmax.f32 %v2817_v15, 0.0 }
 0x1fc   :  { %v1967_v26 = vmax.f32 %v2814_v18, 0.0  ;;  %v1969_v27 = vmax.f32 %v2818_v19, 0.0 }
 0x1fd   :  { %v1970_v28 = vpack.c.bf16 %v1966_v22, %v1962_v20  ;;  %v1972_v29 = vpack.c.bf16 %v1968_v23, %v1964_v21 }
 0x1fe   :  { %v1971_v30 = vpack.c.bf16 %v1967_v26, %v1963_v24  ;;  %v1973_v31 = vpack.c.bf16 %v1969_v27, %v1965_v25 }
 0x200   :  { %2269 = vmatprep.mubr.bf16.mxu0 %v1971_v30  ;;  %2310 = vmatprep.mubr.bf16.mxu1 %v1973_v31 }
 0x201   :  { %2270 = vmatmul.mubr.bf16.vlgmr.msra.gmra.mrb[4].mxu0 %v1970_v28  ;;  %2311 = vmatmul.mubr.bf16.vlgmr.msra.gmra.mrb[4].mxu1 %v1972_v29 }
 0x202   :  { %2792 = vmatpush3.bf16.msra.mxu0 %v3259_v32  ;;  %2807 = vmatprep.mubr.msk.bf16.mxu0 %vm3322_vm2, %v3321_v56 }
 0x203   :  { %2793 = vmatprep.subr.bf16.mxu0 %v3321_v56 }
 0x206   :  { %2794 = vmatpush3.bf16.msra.mxu0 %v3260_v33 }
 0x207   :  { %2795 = vmatprep.subr.bf16.mxu0 %v3321_v56 }
 0x20a   :  { %2796 = vmatpush3.bf16.msra.mxu0 %v3261_v34 }
 0x20b   :  { %2797 = vmatprep.subr.bf16.mxu0 %v3321_v56 }
 0x20e   :  { %2798 = vmatpush3.bf16.msra.mxu0 %v3262_v35 }
 0x20f   :  { %2799 = vmatprep.subr.bf16.mxu0 %v3321_v56 }
 0x212   :  { %2800 = vmatpush3.bf16.msra.mxu0 %v3263_v36 }
 0x213   :  { %2801 = vmatprep.subr.bf16.mxu0 %v3321_v56 }
 0x216   :  { %2802 = vmatpush3.bf16.msra.mxu0 %v3264_v37 }
 0x217   :  { %2803 = vmatprep.subr.bf16.mxu0 %v3321_v56 }
 0x21a   :  { %2804 = vmatpush3.bf16.msra.mxu0 %v3265_v38 }
 0x21b   :  { %2805 = vmatprep.subr.bf16.mxu0 %v3321_v56 }
 0x21e   :  { %2806 = vmatpush3.bf16.msra.mxu0 %v3266_v39 }
 0x2d4   :  { %v2754_v40 = vpop.f32.mrb[4].mxu0  ;;  %v2776_v41 = vpop.f32.mrb[4].mxu1 }
 0x2d5   :  { %v2755_v43 = vpop.f32.mrb[5].mxu0  ;;  %v2777_v44 = vpop.f32.mrb[5].mxu1 }
 0x2d6   :  { %v2756_v45 = vadd.f32 %v2755_v43, %v2754_v40  ;;  %v2778_v46 = vadd.f32 %v2777_v44, %v2776_v41  ;;  %v2757_v47 = vpop.f32.mrb[6].mxu0  ;;  %v2779_v48 = vpop.f32.mrb[6].mxu1 }
 0x2d7   :  { %v2758_v49 = vpop.f32.mrb[7].mxu0  ;;  %v2780_v50 = vpop.f32.mrb[7].mxu1 }
 0x2d8   :  { %v2272_v51 = vadd.f32 %v2756_v45, %v2696_v42  ;;  %v2759_v52 = vadd.f32 %v2758_v49, %v2757_v47  ;;  %v2781_v53 = vadd.f32 %v2780_v50, %v2779_v48 }
 0x2da   :  { %v2313_v54 = vadd.f32 %v2778_v46, %v2272_v51  ;;  %v2275_v55 = vadd.f32 %v2759_v52, %v2696_v42 }
 0x2dc   :  { %v2316_v56 = vadd.f32 %v2781_v53, %v2275_v55 }
 0x2de   :  { %v2319_v57 = vpack.c.bf16 %v2316_v56, %v2313_v54 }
 0x2e0   :  { %2808 = vmatmul.mubr.bf16.vlgmr.msra.gmra.mrb[8].mxu0 %v2319_v57 }
 0x3b3   :  { %v2425_v59 = vpop.f32.mrb[8].mxu0 }
 0x3b4   :  { %v2426_v60 = vadd.f32 %v2729_v58, %v2425_v59  ;;  %v2809_v61 = vpop.f32.mrb[9].mxu0 }
 0x3b5   :  { %v2428_v62 = vpop.f32.mrb[10].mxu0 }
 0x3b6   :  { %2432 = vst [vmem:[%s3492_s7] sm:$0xff] %v2426_v60  ;;  %v2429_v63 = vadd.f32 %v2729_v58, %v2428_v62  ;;  %v2810_v0 = vpop.f32.mrb[11].mxu0 }
 0x3b8   :  { %2433 = vst [vmem:[%s3492_s7 + $0x8] sm:$0xff] %v2429_v63 }
 0x3b9   :  { %2438 = vsyncpa [#allocation3], 1 }
 0x3ba   :  { %2439 = vsyncpa [#allocation5], 1 }

</bundles_post_ra>
